<compile_context>
chip_gen: v7x
topology: tpu7x:2x2x1
jax: 0.10.0
libtpu: 0.0.40
codegen_flags: <defaults>
</compile_context>

<pallas_src>
import jax
import jax.numpy as jnp
from jax import lax
from jax.experimental import pallas as pl
from jax.experimental.pallas import tpu as pltpu


def _round_up(x, m):
    return ((x + m - 1) // m) * m


def mlp_actor_kernel(obs_ref, msg_ref,
                     w1o_ref, w1m_ref, b1_ref,
                     w2_ref, b2_ref,
                     w3_ref, b3_ref,
                     w4_ref, b4_ref,
                     out_ref):
    # obs_ref: (TILE_B, obs)     msg_ref: (TILE_B, msg)       [compute_dtype]
    # w1o_ref: (obs, mid)        w1m_ref: (msg, mid)          [compute_dtype]
    # w2/w3  : (mid, mid)        w4_ref : (mid, out)          [f32]
    # b1/b2/b3: (mid, 1)         b4_ref : (out, 1)            [f32]
    # out_ref: (out, TILE_B)  -- batch on the lane axis -> lane-dense everywhere.
    c_in = (((0,), (1,)), ((), ()))   # contract W's in-dim with the (B, in) input
    c_t = (((0,), (0,)), ((), ()))    # contract W's in-dim with h^T's dim 0

    # Layer 1 (torch.cat fused into two matmuls), computed transposed:
    #   h^T = W1_obs^T @ obs^T + W1_msg^T @ msg^T   -> (mid, TILE_B)
    ht = lax.dot_general(w1o_ref[...], obs_ref[...], c_in,
                         preferred_element_type=jnp.float32)
    ht = ht + lax.dot_general(w1m_ref[...], msg_ref[...], c_in,
                              preferred_element_type=jnp.float32)
    ht = jnp.maximum(ht + b1_ref[...], 0.0)

    # Layers 2 and 3, still batch-on-lanes (f32 math).
    ht = jnp.maximum(
        lax.dot_general(w2_ref[...], ht, c_t,
                        preferred_element_type=jnp.float32) + b2_ref[...], 0.0)
    ht = jnp.maximum(
        lax.dot_general(w3_ref[...], ht, c_t,
                        preferred_element_type=jnp.float32) + b3_ref[...], 0.0)

    # Layer 4: (out, TILE_B) -> wide, unmasked lane-dense stores.
    logits_t = lax.dot_general(w4_ref[...], ht, c_t,
                               preferred_element_type=jnp.float32)
    out_ref[...] = jnp.tanh(logits_t + b4_ref[...]).astype(out_ref.dtype)


def mlp_actor_forward(obs, msg, w1, b1, w2, b2, w3, b3, w4, b4,
                      *, tile_b=4096, compute_dtype=jnp.bfloat16):
    """MLPActor forward.

    obs: (B, obs_size), msg: (B, msg_size).  Weights are stored pre-transposed
    as (in_features, out_features); biases as (1, out_features).  Returns a
    (B, output_size) float32 array.
    """
    B, obs_size = obs.shape
    msg_size = msg.shape[1]
    mid = w1.shape[1]
    out_size = w4.shape[1]

    # ---- batch tiling ------------------------------------------------------
    # Lane-dense output stores need tile % 128 == 0 unless a single block
    # covers the whole batch.  Prefer tilings that avoid a wrapper-side
    # jnp.pad (which would be a full extra HBM read+write of obs/msg).
    tile_req = max(128, (int(tile_b) // 128) * 128)

    if B % 128 == 0:
        b_pad = B
        cap = tile_req
        if B >= 256:                       # v7x megacore: keep >= 2 grid steps
            cap = min(cap, B // 2)
        t = max(128, (cap // 128) * 128)
        while B % t:                       # largest 128-multiple divisor of B
            t -= 128
        tile = t
    elif B <= tile_req:
        # One full-extent block: no padding copy, (8,128) rule does not apply.
        b_pad, tile = B, B
    else:
        # Large ragged batch: pad up to a multiple of 128.
        # TODO(synk): mask the last tile using the true B as an SMEM scalar to
        # avoid this extra HBM read+write of obs/msg for large ragged batches.
        b_pad = _round_up(B, 128)
        cap = min(tile_req, b_pad)
        if b_pad >= 256:
            cap = min(cap, _round_up(b_pad // 2, 128))
        t = max(128, (cap // 128) * 128)
        while b_pad % t:
            t -= 128
        tile = t
        obs = jnp.pad(obs, ((0, b_pad - B), (0, 0)))
        msg = jnp.pad(msg, ((0, b_pad - B), (0, 0)))

    grid = (b_pad // tile,)

    # ---- one-time tiny parameter re-layout ---------------------------------
    # Split W1 into obs/msg row blocks (fuses torch.cat); cast the streamed
    # operands to compute_dtype; biases become lane-broadcast columns.
    obs = obs.astype(compute_dtype)
    msg = msg.astype(compute_dtype)
    w1_obs = w1[:obs_size, :].astype(compute_dtype)     # (obs_size, mid)
    w1_msg = w1[obs_size:, :].astype(compute_dtype)     # (msg_size, mid)
    w2 = jnp.asarray(w2, jnp.float32)
    w3 = jnp.asarray(w3, jnp.float32)
    w4 = jnp.asarray(w4, jnp.float32)                   # (mid, out) untransposed
    b1c = jnp.asarray(b1, jnp.float32).reshape(mid, 1)
    b2c = jnp.asarray(b2, jnp.float32).reshape(mid, 1)
    b3c = jnp.asarray(b3, jnp.float32).reshape(mid, 1)
    b4c = jnp.asarray(b4, jnp.float32).reshape(out_size, 1)

    resident = lambda i: (0, 0)        # same block every step -> stays in VMEM

    # ---- explicit VMEM budget (v7x has 64 MiB physical per TensorCore) -----
    isz = jnp.dtype(compute_dtype).itemsize
    vmem_est = (
        2 * tile * (obs_size + msg_size) * isz          # double-buffered inputs
        + 2 * out_size * tile * 4                       # double-buffered output
        + 8 * mid * tile * 4                            # in-kernel activations
        + 4 * (obs_size + msg_size + 2 * mid + out_size) * mid * 4  # params
        + (2 << 20)                                     # headroom
    )
    vmem_limit = int(min(max(vmem_est, 16 << 20), 48 << 20))

    out_t = pl.pallas_call(
        mlp_actor_kernel,
        out_shape=jax.ShapeDtypeStruct((out_size, b_pad), jnp.float32),
        grid=grid,
        in_specs=[
            pl.BlockSpec((tile, obs_size), lambda i: (i, 0)),
            pl.BlockSpec((tile, msg_size), lambda i: (i, 0)),
            pl.BlockSpec((obs_size, mid), resident),
            pl.BlockSpec((msg_size, mid), resident),
            pl.BlockSpec((mid, 1), resident),
            pl.BlockSpec((mid, mid), resident),
            pl.BlockSpec((mid, 1), resident),
            pl.BlockSpec((mid, mid), resident),
            pl.BlockSpec((mid, 1), resident),
            pl.BlockSpec((mid, out_size), resident),
            pl.BlockSpec((out_size, 1), resident),
        ],
        out_specs=pl.BlockSpec((out_size, tile), lambda i: (0, i)),
        compiler_params=pltpu.CompilerParams(
            dimension_semantics=("parallel",),
            vmem_limit_bytes=vmem_limit),
    )(obs, msg, w1_obs, w1_msg, b1c, w2, b2c, w3, b3c, w4, b4c)

    # Undo the lane-dense (out, B_pad) layout and drop any padded rows.
    return out_t[:, :B].T


def mlp_actor_reference(obs, msg, w1, b1, w2, b2, w3, b3, w4, b4):
    x = jnp.concatenate([obs, msg], axis=-1)
    h = jnp.maximum(x @ w1 + b1, 0.0)
    h = jnp.maximum(h @ w2 + b2, 0.0)
    h = jnp.maximum(h @ w3 + b3, 0.0)
    return jnp.tanh(h @ w4 + b4)


if __name__ == "__main__":
    obs_size, msg_size, mid_size, output_size = 24, 8, 32, 4
    d_in = obs_size + msg_size

    key = jax.random.PRNGKey(0)
    keys = jax.random.split(key, 11)

    # Deterministic PyTorch-Linear-style uniform init, stored as (in, out).
    def linear_params(kw, kb, fan_in, fan_out):
        bound = 1.0 / jnp.sqrt(fan_in)
        w = jax.random.uniform(kw, (fan_in, fan_out), jnp.float32, -bound, bound)
        b = jax.random.uniform(kb, (1, fan_out), jnp.float32, -bound, bound)
        return w, b

    w1, b1 = linear_params(keys[2], keys[3], d_in, mid_size)
    w2, b2 = linear_params(keys[4], keys[5], mid_size, mid_size)
    w3, b3 = linear_params(keys[6], keys[7], mid_size, mid_size)
    w4, b4 = linear_params(keys[8], keys[9], mid_size, output_size)
    params = (w1, b1, w2, b2, w3, b3, w4, b4)

    # Case 1: tiny batch -> single full-extent block, no padding, grid=(1,).
    # Case 2: multiple-of-128 batch -> lane-dense tiles, grid=(2,), no padding.
    for batch in (64, 512):
        ko, km = jax.random.split(jax.random.fold_in(keys[10], batch))
        obs = jax.random.normal(ko, (batch, obs_size), dtype=jnp.float32)
        msg = jax.random.normal(km, (batch, msg_size), dtype=jnp.float32)

        out = mlp_actor_forward(obs, msg, *params)
        out = jax.block_until_ready(out)
        ref = mlp_actor_reference(obs, msg, *params)

        assert out.shape == (batch, output_size)
        # bf16-streamed inputs vs the pure-f32 reference: tolerance loosened
        # per review (bf16 cast of obs/msg/W1 only; all math accumulates f32).
        assert jnp.allclose(out, ref, atol=3e-2, rtol=0.0), \
            f"mismatch vs reference at batch={batch}"
        assert bool(jnp.all(jnp.abs(out) <= 1.0)), "tanh output must lie in [-1, 1]"

    print("KERNEL_OK")
</pallas_src>

<mosaic_0001>
module attributes {stable_mosaic.version = 11 : i64} {
  func.func @mlp_actor_kernel(%arg0: i32, %arg1: memref<64x24xbf16, #tpu.memory_space<vmem>>, %arg2: memref<64x8xbf16, #tpu.memory_space<vmem>>, %arg3: memref<24x32xbf16, #tpu.memory_space<vmem>>, %arg4: memref<8x32xbf16, #tpu.memory_space<vmem>>, %arg5: memref<32x1xf32, #tpu.memory_space<vmem>>, %arg6: memref<32x32xf32, #tpu.memory_space<vmem>>, %arg7: memref<32x1xf32, #tpu.memory_space<vmem>>, %arg8: memref<32x32xf32, #tpu.memory_space<vmem>>, %arg9: memref<32x1xf32, #tpu.memory_space<vmem>>, %arg10: memref<32x4xf32, #tpu.memory_space<vmem>>, %arg11: memref<4x1xf32, #tpu.memory_space<vmem>>, %arg12: memref<4x64xf32, #tpu.memory_space<vmem>>) attributes {dimension_semantics = [#tpu.dimension_semantics<parallel>], iteration_bounds = array<i64: 1>, scalar_prefetch = 0 : i64, scratch_operands = 0 : i64, tpu.core_type = #tpu.core_type<tc>, window_params = [{transform_indices = @transform_0, window_bounds = array<i64: 64, 24>}, {transform_indices = @transform_1, window_bounds = array<i64: 64, 8>}, {pipeline_mode = #tpu.pipeline_mode<synchronous>, transform_indices = @transform_2, window_bounds = array<i64: 24, 32>}, {pipeline_mode = #tpu.pipeline_mode<synchronous>, transform_indices = @transform_3, window_bounds = array<i64: 8, 32>}, {pipeline_mode = #tpu.pipeline_mode<synchronous>, transform_indices = @transform_4, window_bounds = array<i64: 32, 1>}, {pipeline_mode = #tpu.pipeline_mode<synchronous>, transform_indices = @transform_5, window_bounds = array<i64: 32, 32>}, {pipeline_mode = #tpu.pipeline_mode<synchronous>, transform_indices = @transform_6, window_bounds = array<i64: 32, 1>}, {pipeline_mode = #tpu.pipeline_mode<synchronous>, transform_indices = @transform_7, window_bounds = array<i64: 32, 32>}, {pipeline_mode = #tpu.pipeline_mode<synchronous>, transform_indices = @transform_8, window_bounds = array<i64: 32, 1>}, {pipeline_mode = #tpu.pipeline_mode<synchronous>, transform_indices = @transform_9, window_bounds = array<i64: 32, 4>}, {pipeline_mode = #tpu.pipeline_mode<synchronous>, transform_indices = @transform_10, window_bounds = array<i64: 4, 1>}, {transform_indices = @transform_11, window_bounds = array<i64: 4, 64>}]} {
    %c0 = arith.constant 0 : index
    %c0_0 = arith.constant 0 : index
    %0 = vector.load %arg3[%c0, %c0_0] : memref<24x32xbf16, #tpu.memory_space<vmem>>, vector<24x32xbf16>
    %c0_1 = arith.constant 0 : index
    %c0_2 = arith.constant 0 : index
    %1 = vector.load %arg1[%c0_1, %c0_2] : memref<64x24xbf16, #tpu.memory_space<vmem>>, vector<64x24xbf16>
    %cst = arith.constant dense<0.000000e+00> : vector<32x64xf32>
    %2 = tpu.matmul %0, %1, %cst {dimension_numbers = #tpu.dot_dimension_numbers<[0], [1], [1], [0], [0, 1, 1, 0], [], []>} : vector<24x32xbf16>, vector<64x24xbf16>, vector<32x64xf32> -> vector<32x64xf32>
    %c0_3 = arith.constant 0 : index
    %c0_4 = arith.constant 0 : index
    %3 = vector.load %arg4[%c0_3, %c0_4] : memref<8x32xbf16, #tpu.memory_space<vmem>>, vector<8x32xbf16>
    %c0_5 = arith.constant 0 : index
    %c0_6 = arith.constant 0 : index
    %4 = vector.load %arg2[%c0_5, %c0_6] : memref<64x8xbf16, #tpu.memory_space<vmem>>, vector<64x8xbf16>
    %cst_7 = arith.constant dense<0.000000e+00> : vector<32x64xf32>
    %5 = tpu.matmul %3, %4, %cst_7 {dimension_numbers = #tpu.dot_dimension_numbers<[0], [1], [1], [0], [0, 1, 1, 0], [], []>} : vector<8x32xbf16>, vector<64x8xbf16>, vector<32x64xf32> -> vector<32x64xf32>
    %6 = arith.addf %2, %5 : vector<32x64xf32>
    %c0_8 = arith.constant 0 : index
    %c0_9 = arith.constant 0 : index
    %7 = vector.load %arg5[%c0_8, %c0_9] : memref<32x1xf32, #tpu.memory_space<vmem>>, vector<32x1xf32>
    %8 = vector.broadcast %7 : vector<32x1xf32> to vector<32x64xf32>
    %9 = arith.addf %6, %8 : vector<32x64xf32>
    %cst_10 = arith.constant 0.000000e+00 : f32
    %10 = vector.broadcast %cst_10 : f32 to vector<32x64xf32>
    %11 = arith.maximumf %9, %10 : vector<32x64xf32>
    %c0_11 = arith.constant 0 : index
    %c0_12 = arith.constant 0 : index
    %12 = vector.load %arg6[%c0_11, %c0_12] : memref<32x32xf32, #tpu.memory_space<vmem>>, vector<32x32xf32>
    %cst_13 = arith.constant dense<0.000000e+00> : vector<32x64xf32>
    %13 = tpu.matmul %12, %11, %cst_13 {dimension_numbers = #tpu.dot_dimension_numbers<[0], [0], [1], [1], [0, 1, 1, 1], [], []>} : vector<32x32xf32>, vector<32x64xf32>, vector<32x64xf32> -> vector<32x64xf32>
    %c0_14 = arith.constant 0 : index
    %c0_15 = arith.constant 0 : index
    %14 = vector.load %arg7[%c0_14, %c0_15] : memref<32x1xf32, #tpu.memory_space<vmem>>, vector<32x1xf32>
    %15 = vector.broadcast %14 : vector<32x1xf32> to vector<32x64xf32>
    %16 = arith.addf %13, %15 : vector<32x64xf32>
    %cst_16 = arith.constant 0.000000e+00 : f32
    %17 = vector.broadcast %cst_16 : f32 to vector<32x64xf32>
    %18 = arith.maximumf %16, %17 : vector<32x64xf32>
    %c0_17 = arith.constant 0 : index
    %c0_18 = arith.constant 0 : index
    %19 = vector.load %arg8[%c0_17, %c0_18] : memref<32x32xf32, #tpu.memory_space<vmem>>, vector<32x32xf32>
    %cst_19 = arith.constant dense<0.000000e+00> : vector<32x64xf32>
    %20 = tpu.matmul %19, %18, %cst_19 {dimension_numbers = #tpu.dot_dimension_numbers<[0], [0], [1], [1], [0, 1, 1, 1], [], []>} : vector<32x32xf32>, vector<32x64xf32>, vector<32x64xf32> -> vector<32x64xf32>
    %c0_20 = arith.constant 0 : index
    %c0_21 = arith.constant 0 : index
    %21 = vector.load %arg9[%c0_20, %c0_21] : memref<32x1xf32, #tpu.memory_space<vmem>>, vector<32x1xf32>
    %22 = vector.broadcast %21 : vector<32x1xf32> to vector<32x64xf32>
    %23 = arith.addf %20, %22 : vector<32x64xf32>
    %cst_22 = arith.constant 0.000000e+00 : f32
    %24 = vector.broadcast %cst_22 : f32 to vector<32x64xf32>
    %25 = arith.maximumf %23, %24 : vector<32x64xf32>
    %c0_23 = arith.constant 0 : index
    %c0_24 = arith.constant 0 : index
    %26 = vector.load %arg10[%c0_23, %c0_24] : memref<32x4xf32, #tpu.memory_space<vmem>>, vector<32x4xf32>
    %cst_25 = arith.constant dense<0.000000e+00> : vector<4x64xf32>
    %27 = tpu.matmul %26, %25, %cst_25 {dimension_numbers = #tpu.dot_dimension_numbers<[0], [0], [1], [1], [0, 1, 1, 1], [], []>} : vector<32x4xf32>, vector<32x64xf32>, vector<4x64xf32> -> vector<4x64xf32>
    %c0_26 = arith.constant 0 : index
    %c0_27 = arith.constant 0 : index
    %28 = vector.load %arg11[%c0_26, %c0_27] : memref<4x1xf32, #tpu.memory_space<vmem>>, vector<4x1xf32>
    %29 = vector.broadcast %28 : vector<4x1xf32> to vector<4x64xf32>
    %30 = arith.addf %27, %29 : vector<4x64xf32>
    %31 = math.tanh %30 : vector<4x64xf32>
    %c0_28 = arith.constant 0 : index
    %c0_29 = arith.constant 0 : index
    %32 = vector.load %arg12[%c0_28, %c0_29] : memref<4x64xf32, #tpu.memory_space<vmem>>, vector<4x64xf32>
    tpu.vector_store %arg12[%c0_28, %c0_29], %31 {strides = array<i32>} : memref<4x64xf32, #tpu.memory_space<vmem>>, vector<4x64xf32>,
    return
  }
  func.func @transform_0(%arg0: i32) -> (i32, i32) {
    %c0_i32 = arith.constant 0 : i32
    %c0_i32_0 = arith.constant 0 : i32
    return %arg0, %c0_i32 : i32, i32
  }
  func.func @transform_1(%arg0: i32) -> (i32, i32) {
    %c0_i32 = arith.constant 0 : i32
    %c0_i32_0 = arith.constant 0 : i32
    return %arg0, %c0_i32 : i32, i32
  }
  func.func @transform_2(%arg0: i32) -> (i32, i32) {
    %c0_i32 = arith.constant 0 : i32
    %c0_i32_0 = arith.constant 0 : i32
    %c0_i32_1 = arith.constant 0 : i32
    return %c0_i32, %c0_i32_0 : i32, i32
  }
  func.func @transform_3(%arg0: i32) -> (i32, i32) {
    %c0_i32 = arith.constant 0 : i32
    %c0_i32_0 = arith.constant 0 : i32
    %c0_i32_1 = arith.constant 0 : i32
    return %c0_i32, %c0_i32_0 : i32, i32
  }
  func.func @transform_4(%arg0: i32) -> (i32, i32) {
    %c0_i32 = arith.constant 0 : i32
    %c0_i32_0 = arith.constant 0 : i32
    %c0_i32_1 = arith.constant 0 : i32
    return %c0_i32, %c0_i32_0 : i32, i32
  }
  func.func @transform_5(%arg0: i32) -> (i32, i32) {
    %c0_i32 = arith.constant 0 : i32
    %c0_i32_0 = arith.constant 0 : i32
    %c0_i32_1 = arith.constant 0 : i32
    return %c0_i32, %c0_i32_0 : i32, i32
  }
  func.func @transform_6(%arg0: i32) -> (i32, i32) {
    %c0_i32 = arith.constant 0 : i32
    %c0_i32_0 = arith.constant 0 : i32
    %c0_i32_1 = arith.constant 0 : i32
    return %c0_i32, %c0_i32_0 : i32, i32
  }
  func.func @transform_7(%arg0: i32) -> (i32, i32) {
    %c0_i32 = arith.constant 0 : i32
    %c0_i32_0 = arith.constant 0 : i32
    %c0_i32_1 = arith.constant 0 : i32
    return %c0_i32, %c0_i32_0 : i32, i32
  }
  func.func @transform_8(%arg0: i32) -> (i32, i32) {
    %c0_i32 = arith.constant 0 : i32
    %c0_i32_0 = arith.constant 0 : i32
    %c0_i32_1 = arith.constant 0 : i32
    return %c0_i32, %c0_i32_0 : i32, i32
  }
  func.func @transform_9(%arg0: i32) -> (i32, i32) {
    %c0_i32 = arith.constant 0 : i32
    %c0_i32_0 = arith.constant 0 : i32
    %c0_i32_1 = arith.constant 0 : i32
    return %c0_i32, %c0_i32_0 : i32, i32
  }
  func.func @transform_10(%arg0: i32) -> (i32, i32) {
    %c0_i32 = arith.constant 0 : i32
    %c0_i32_0 = arith.constant 0 : i32
    %c0_i32_1 = arith.constant 0 : i32
    return %c0_i32, %c0_i32_0 : i32, i32
  }
  func.func @transform_11(%arg0: i32) -> (i32, i32) {
    %c0_i32 = arith.constant 0 : i32
    %c0_i32_0 = arith.constant 0 : i32
    return %c0_i32, %arg0 : i32, i32
  }
}

</mosaic_0001>

<bundles_post_ra>
// kernel: tpu_custom_call.1
= control target key start
LH: loop header
LB: loop body
LE: loop exit
PB: predicated region body
PF: predicated region fallthrough
CT: control target
= control target key end

     0   :  { %vm96_vm0 = vcmask 64512   ;;  %vm210_vm1 = vcmask 195584   ;;  %v961_v9 = vmov 0   ;;  %s1177_s0 = inlined_call_operand.vmem [shape: bf16[64,24], index: 0, kind: input, shape index: {}]   ;;  %s1178_s1 = inlined_call_operand.vmem [shape: bf16[64,8], index: 1, kind: input, shape index: {}]   ;;  %s1179_s2 = inlined_call_operand.vmem [shape: bf16[24,32], index: 2, kind: input, shape index: {}]   ;;  %s1180_s3 = inlined_call_operand.vmem [shape: bf16[8,32], index: 3, kind: input, shape index: {}]   ;;  %s1181_s4 = inlined_call_operand.vmem [shape: f32[32,1], index: 4, kind: input, shape index: {}]   ;;  %s1182_s5 = inlined_call_operand.vmem [shape: f32[32,32], index: 5, kind: input, shape index: {}]   ;;  %s1183_s6 = inlined_call_operand.vmem [shape: f32[32,1], index: 6, kind: input, shape index: {}]   ;;  %s1184_s7 = inlined_call_operand.vmem [shape: f32[32,32], index: 7, kind: input, shape index: {}]   ;;  %s1185_s8 = inlined_call_operand.vmem [shape: f32[32,1], index: 8, kind: input, shape index: {}]   ;;  %s1186_s9 = inlined_call_operand.vmem [shape: f32[32,4], index: 9, kind: input, shape index: {}]   ;;  %s1187_s10 = inlined_call_operand.vmem [shape: f32[4,1], index: 10, kind: input, shape index: {}]   ;;  %s1188_s11 = inlined_call_operand.hbm [shape: f32[4,64], index: 11, kind: output, shape index: {}]  }
   0x1   :  { %v51_v0 = vld [vmem:[%s1180_s3] sm:$0xf]  ;;  %v928_v3 = vld [vmem:[%s1178_s1 + $0x8] sm:$0xff]   ;;  %923 = vset.pattern.permute.xlu1 %v961_v9  ;;  %v930_v11 = vld [vmem:[%s1178_s1 + $0x10] sm:$0xff]  }
   0x2   :  { %60 = vxpose.xlu0.c.b16.start.end [1/1] (short) (narrow) %v51_v0, 32  ;;  %v925_v1 = vld [vmem:[%s1179_s2] sm:$0xff]   ;;  %v926_v6 = vld [vmem:[%s1179_s2 + $0x8] ss:$0 sps:$4 sm:$0xff]   ;;  %v107_v10 = vsel %vm96_vm0, %v928_v3, 0  ;;  %v933_v15 = vld [vmem:[%s1177_s0 + $0x10] sm:$0xff]  }
   0x3   :  { %v927_v2 = vld [vmem:[%s1178_s1] sm:$0xff]   ;;  %v931_v8 = vld [vmem:[%s1177_s0 + $0x8] sm:$0xff]   ;;  %v280_v17 = vld [vmem:[%s1181_s4 + $0x10] sm:$0xff] }
   0x4   :  { %910 = vmatprep.subr.msk.bf16.mxu1 %vm96_vm0, %v927_v2  ;;  %v104_v4 = vsel %vm96_vm0, %v927_v2, 0  ;;  %v929_v5 = vld [vmem:[%s1177_s0] sm:$0xff]   ;;  %v279_v13 = vld [vmem:[%s1181_s4 + $0x8] sm:$0xff]  ;;  %v221_v14 = vsel %vm210_vm1, %v931_v8, 0 }
   0x5   :  { %822 = vmatpush3.bf16.xpose.msra.mxu1 %v104_v4  ;;  %v218_v7 = vsel %vm210_vm1, %v929_v5, 0  ;;  %914 = vmatprep.subr.msk.bf16.mxu0 %vm210_vm1, %v929_v5  ;;  %v278_v12 = vld [vmem:[%s1181_s4] sm:$0xff]  ;;  %v311_v18 = vld [vmem:[%s1182_s5 + $0x8] sm:$0xff] }
   0x6   :  { %911 = vmatprep.subr.msk.bf16.mxu1 %vm96_vm0, %v928_v3  ;;  %834 = vmatpush3.bf16.xpose.msra.mxu0 %v218_v7  ;;  %v310_v16 = vld [vmem:[%s1182_s5] sm:$0xff] }
   0x7   :  { %174 = vxpose.xlu0.c.b16.start [1/2] (short) (narrow) %v925_v1, 32  ;;  %915 = vmatprep.subr.msk.bf16.mxu0 %vm210_vm1, %v931_v8 }
   0x8   :  { %284 = vperm.xlu1 %923, %v278_v12  }
   0xb   :  { %175 = vxpose.xlu0.c.b16.end [2/2] (short) (narrow) %v926_v6, 32 }
   0xc   :  { %289 = vperm.xlu1 %923, %v279_v13  }
   0xd   :  { %824 = vmatpush3.bf16.xpose.msra.mxu1 %v107_v10 }
   0xe   :  { %912 = vmatprep.subr.msk.bf16.mxu1 %vm96_vm0, %v930_v11  ;;  %836 = vmatpush3.bf16.xpose.msra.mxu0 %v221_v14 }
   0xf   :  { %338 = vxpose.xlu0.b32.start [1/4] (short) (narrow) %v310_v16, 32 }
  0x10   :  { %16 = vsyncpa [#allocation3], 0  ;;  %916 = vmatprep.subr.msk.bf16.mxu0 %vm210_vm1, %v933_v15  ;;  %v110_v19 = vsel %vm96_vm0, %v930_v11, 0  ;;  %v932_v20 = vld [vmem:[%s1178_s1 + $0x18] sm:$0xff]   ;;  %294 = vperm.xlu1 %923, %v280_v17   ;;  %v312_v22 = vld [vmem:[%s1182_s5 + $0x10] sm:$0xff]  ;;  %v224_v23 = vsel %vm210_vm1, %v933_v15, 0 }
  0x11   :  { %v281_v21 = vld [vmem:[%s1181_s4 + $0x18] sm:$0xff]  ;;  %v314_v25 = vld [vmem:[%s1183_s6] sm:$0xff]  ;;  %v113_v27 = vsel %vm96_vm0, %v932_v20, 0  ;;  %v315_v28 = vld [vmem:[%s1183_s6 + $0x8] sm:$0xff]  ;;  %vm370_vm2 = vcmask 261120   ;;  %vm963_vm3 = vmmov 0  }
  0x12   :  { %v934_v24 = vld [vmem:[%s1177_s0 + $0x18] sm:$0xff]   ;;  %v316_v30 = vld [vmem:[%s1183_s6 + $0x10] sm:$0xff]  ;;  %v476_v32 = vld [vmem:[%s1185_s8] sm:$0xff]  ;;  %vm749_vm4 = vcmask 519168  }
  0x13   :  { %339 = vxpose.xlu0.b32.cont [2/4] (short) (narrow) %v311_v18, 32  ;;  %v313_v26 = vld [vmem:[%s1182_s5 + $0x18] sm:$0xff]  ;;  %v227_v29 = vsel %vm210_vm1, %v934_v24, 0  ;;  %v477_v33 = vld [vmem:[%s1185_s8 + $0x8] sm:$0xff]  ;;  %v478_v34 = vld [vmem:[%s1185_s8 + $0x10] sm:$0xff] }
  0x14   :  { %299 = vperm.xlu1 %923, %v281_v21   ;;  %v317_v31 = vld [vmem:[%s1183_s6 + $0x18] sm:$0xff]  ;;  %v637_v36 = vld [vmem:[%s1187_s10] sm:$0xf]  ;;  %v473_v43 = vld [vmem:[%s1184_s7 + $0x8] sm:$0xff] }
  0x15   :  { %826 = vmatpush3.bf16.xpose.msra.mxu1 %v110_v19  ;;  %v479_v35 = vld [vmem:[%s1185_s8 + $0x18] sm:$0xff]  ;;  %v472_v42 = vld [vmem:[%s1184_s7] sm:$0xff]  ;;  %v474_v44 = vld [vmem:[%s1184_s7 + $0x10] sm:$0xff] }
  0x16   :  { %913 = vmatprep.subr.msk.bf16.mxu1 %vm96_vm0, %v932_v20  ;;  %838 = vmatpush3.bf16.xpose.msra.mxu0 %v224_v23  ;;  %v475_v45 = vld [vmem:[%s1184_s7 + $0x18] sm:$0xff]  ;;  %v633_v13 = vld [vmem:[%s1186_s9] sm:$0xff]  ;;  %v634_v14 = vld [vmem:[%s1186_s9 + $0x8] sm:$0xff] }
  0x17   :  { %340 = vxpose.xlu0.b32.cont [3/4] (short) (narrow) %v312_v22, 32  ;;  %917 = vmatprep.subr.msk.bf16.mxu0 %vm210_vm1, %v934_v24  ;;  %v635_v15 = vld [vmem:[%s1186_s9 + $0x10] sm:$0xff]  ;;  %v636_v16 = vld [vmem:[%s1186_s9 + $0x18] sm:$0xff]  ;;  %s965_s9 = smov [#allocation2]  }
  0x18   :  { %320 = vperm.xlu1 %923, %v314_v25   ;;  %s757_s15 = sshll.u32 %s965_s9, 4  ;;  %s758_s15 = int_to_ptr.vmem [resolvable:$true] %s757_s15 }
  0x19   :  { %s937_s5 = scalar_lea.vmem %s758_s15, 64  ;;  %p942_p1 = scmp.lt.s32.totalorder %s758_s15, %s758_s15 }
  0x1a   :  { %p938_p0 = scmp.ne.s32.totalorder %s758_s15, %s937_s5  ;;  %p943_p2 = scmp.lt.s32.totalorder %s937_s5, %s937_s5 }
  0x1b   :  { %341 = vxpose.xlu0.b32.end [4/4] (short) (narrow) %v313_v26, 32 }
  0x1c   :  { %325 = vperm.xlu1 %923, %v315_v28   ;;  %p944_p3 = por %p943_p2, %p942_p1 }
  0x1d   :  { %828 = vmatpush3.bf16.xpose.msra.mxu1 %v113_v27 }
  0x1e   :  { %840 = vmatpush3.bf16.xpose.msra.mxu0 %v227_v29  ;;  %p945_p4 = pnand %p944_p3, %p938_p0 }
  0x1f   :  { %500 = vxpose.xlu0.b32.start [1/4] (short) (narrow) %v472_v42, 32 }
  0x20   :  { %330 = vperm.xlu1 %923, %v316_v30  }
  0x23   :  { %501 = vxpose.xlu0.b32.cont [2/4] (short) (narrow) %v473_v43, 32 }
  0x24   :  { %335 = vperm.xlu1 %923, %v317_v31  }
  0x27   :  { %502 = vxpose.xlu0.b32.cont [3/4] (short) (narrow) %v474_v44, 32 }
  0x28   :  { %482 = vperm.xlu1 %923, %v476_v32  }
  0x2b   :  { %503 = vxpose.xlu0.b32.end [4/4] (short) (narrow) %v475_v45, 32 }
  0x2c   :  { %487 = vperm.xlu1 %923, %v477_v33  }
  0x2f   :  { %643 = vxpose.xlu0.b32.start [1/4] (short) (narrow) %v633_v13, 8 }
  0x30   :  { %492 = vperm.xlu1 %923, %v478_v34  }
  0x33   :  { %644 = vxpose.xlu0.b32.cont [2/4] (short) (narrow) %v634_v14, 8 }
  0x34   :  { %497 = vperm.xlu1 %923, %v479_v35  }
  0x37   :  { %645 = vxpose.xlu0.b32.cont [3/4] (short) (narrow) %v635_v15, 8 }
  0x38   :  { %640 = vperm.xlu1 %923, %v637_v36  }
  0x3b   :  { %646 = vxpose.xlu0.b32.end [4/4] (short) (narrow) %v636_v16, 8 }
  0x64   :  { %924 = vset.pattern.permute.xlu0 %v961_v9 }
  0x68   :  { %v68_v37 = vpop.trf.xlu0 }
  0x69   :  { %829 = vmatprep.mubr.msk.bf16.mxu1 %vm96_vm0, %v68_v37  ;;  %v962_v37 = vmov 0.0|0.0  }
  0x6c   :  { %v69_v38 = vpop.trf.xlu0 }
  0x6d   :  { %830 = vmatmul.mubr.msk.bf16.vlgmr.msra.gmra.mrb[0].mxu1 %vm96_vm0, %v69_v38  ;;  %v964_v38 = vmov 0.0  }
  0x70   :  { %v182_v39 = vpop.trf.xlu0 }
  0x71   :  { %841 = vmatprep.mubr.msk.bf16.mxu0 %vm210_vm1, %v182_v39 }
  0x74   :  { %v183_v40 = vpop.trf.xlu0 }
  0x75   :  { %842 = vmatmul.mubr.msk.bf16.vlgmr.msra.gmra.mrb[0].mxu0 %vm210_vm1, %v183_v40 }
  0x87   :  { %v285_v46 = vpop.permute.xlu1 %284 }
  0x8b   :  { %v290_v47 = vpop.permute.xlu1 %289 }
  0x8f   :  { %v354_v41 = vpop.trf.xlu0  ;;  %v295_v52 = vpop.permute.xlu1 %294 }
  0x90   :  { %853 = vmatprep.mubr.msk.f32.mxu0 %vm370_vm2, %v354_v41 }
  0x93   :  { %v300_v61 = vpop.permute.xlu1 %299  ;;  %v355_v7 = vpop.trf.xlu0 }
  0x97   :  { %v356_v10 = vpop.trf.xlu0  ;;  %v321_v17 = vpop.permute.xlu1 %320 }
  0x9b   :  { %v357_v11 = vpop.trf.xlu0  ;;  %v326_v18 = vpop.permute.xlu1 %325 }
  0x9f   :  { %v516_v12 = vpop.trf.xlu0  ;;  %v331_v19 = vpop.permute.xlu1 %330 }
  0xa0   :  { %867 = vmatprep.mubr.msk.f32.mxu1 %vm370_vm2, %v516_v12 }
  0xa3   :  { %v336_v25 = vpop.permute.xlu1 %335  ;;  %v517_v30 = vpop.trf.xlu0 }
  0xa7   :  { %v518_v35 = vpop.trf.xlu0  ;;  %v483_v39 = vpop.permute.xlu1 %482 }
  0xab   :  { %v519_v36 = vpop.trf.xlu0  ;;  %v488_v40 = vpop.permute.xlu1 %487 }
  0xaf   :  { %v493_v41 = vpop.permute.xlu1 %492 }
 0x140   :  { %v831_v48 = vpop.f32.mrb[0].mxu1 }
 0x141   :  { %v149_v49 = vpop.f32.mrb[1].mxu1 }
 0x142   :  { %v832_v50 = vpop.f32.mrb[2].mxu1 }
 0x143   :  { %v152_v51 = vpop.f32.mrb[3].mxu1 }
 0x148   :  { %v843_v53 = vpop.f32.mrb[0].mxu0 }
 0x149   :  { %v272_v54 = vadd.f32 %v843_v53, %v831_v48  ;;  %v263_v55 = vpop.f32.mrb[1].mxu0 }
 0x14a   :  { %v264_v56 = vadd.f32 %v263_v55, %v149_v49  ;;  %v844_v57 = vpop.f32.mrb[2].mxu0 }
 0x14b   :  { %v304_v58 = vadd.f32 %v295_v52, %v272_v54  ;;  %v275_v59 = vadd.f32 %v844_v57, %v832_v50  ;;  %v266_v60 = vpop.f32.mrb[3].mxu0  ;;  %v659_v57 = vpop.trf.xlu0 }
 0x14c   :  { %v302_v62 = vadd.f32 %v285_v46, %v264_v56  ;;  %v267_v63 = vadd.f32 %v266_v60, %v152_v51 }
 0x14d   :  { %v305_v0 = vadd.f32 %v300_v61, %v275_v59  ;;  %v308_v2 = vmax.f32 %v304_v58, 0.0 }
 0x14e   :  { %v303_v1 = vadd.f32 %v290_v47, %v267_v63  ;;  %v306_v4 = vmax.f32 %v302_v62, 0.0  ;;  %v498_v47 = vpop.permute.xlu1 %497 }
 0x14f   :  { %v309_v3 = vmax.f32 %v305_v0, 0.0 }
 0x150   :  { %v307_v5 = vmax.f32 %v303_v1, 0.0 }
 0x151   :  { %v888_v6 = vpack.c.bf16 %v309_v3, %v308_v2 }
 0x152   :  { %v884_v8 = vpack.c.bf16 %v307_v5, %v306_v4  ;;  %v641_v58 = vpop.permute.xlu1 %640 }
 0x154   :  { %885 = vmatprep.subr.bf16.mxu0 %v884_v8 }
 0x155   :  { %887 = vmatpush3.bf16.msra.mxu0 %v884_v8 }
 0x156   :  { %889 = vmatprep.subr.bf16.mxu0 %v888_v6 }
 0x159   :  { %891 = vmatpush3.bf16.msra.mxu0 %v888_v6 }
 0x15c   :  { %854 = vmatmul.mubr.msk.f32.vlgmr.msra.gmra.mrb[4].mxu0 %vm370_vm2, %v355_v7 }
 0x15d   :  { %856 = vmatprep.mubr.msk.f32.mxu0 %vm370_vm2, %v356_v10 }
 0x160   :  { %857 = vmatmul.mubr.msk.f32.gmra.mrb[6].mxu0 %vm370_vm2, %v357_v11 }
 0x22f   :  { %v855_v20 = vpop.f32.mrb[4].mxu0 }
 0x230   :  { %v455_v21 = vadd.f32 %v855_v20, %v326_v18  ;;  %v449_v22 = vpop.f32.mrb[5].mxu0 }
 0x231   :  { %v450_v23 = vadd.f32 %v449_v22, %v321_v17 }
 0x232   :  { %v469_v24 = vmax.f32 %v455_v21, 0.0 }
 0x233   :  { %v468_v26 = vmax.f32 %v450_v23, 0.0  ;;  %v858_v27 = vpop.f32.mrb[6].mxu0 }
 0x234   :  { %v465_v28 = vadd.f32 %v858_v27, %v336_v25  ;;  %v459_v29 = vpop.f32.mrb[7].mxu0 }
 0x235   :  { %v892_v31 = vpack.c.bf16 %v469_v24, %v468_v26  ;;  %v460_v32 = vadd.f32 %v459_v29, %v331_v19 }
 0x236   :  { %v471_v33 = vmax.f32 %v465_v28, 0.0 }
 0x237   :  { %v470_v34 = vmax.f32 %v460_v32, 0.0  ;;  %893 = vmatprep.subr.bf16.mxu1 %v892_v31 }
 0x238   :  { %895 = vmatpush3.bf16.msra.mxu1 %v892_v31 }
 0x239   :  { %v896_v9 = vpack.c.bf16 %v471_v33, %v470_v34 }
 0x23b   :  { %897 = vmatprep.subr.bf16.mxu1 %v896_v9 }
 0x23c   :  { %899 = vmatpush3.bf16.msra.mxu1 %v896_v9 }
 0x23d   :  { %900 = vmatprep.subr.bf16.mxu1 %v962_v37 }
 0x23f   :  { %868 = vmatmul.mubr.msk.f32.vlgmr.msra.gmra.mrb[4].mxu1 %vm370_vm2, %v517_v30 }
 0x240   :  { %870 = vmatprep.mubr.msk.f32.mxu1 %vm370_vm2, %v518_v35 }
 0x243   :  { %871 = vmatmul.mubr.msk.f32.gmra.mrb[6].mxu1 %vm370_vm2, %v519_v36 }
 0x244   :  { %881 = vmatprep.mubr.msk.f32.mxu1 %vm963_vm3, %v964_v38 }
 0x312   :  { %v869_v42 = vpop.f32.mrb[4].mxu1 }
 0x313   :  { %v616_v43 = vadd.f32 %v869_v42, %v488_v40  ;;  %v610_v44 = vpop.f32.mrb[5].mxu1 }
 0x314   :  { %v611_v45 = vadd.f32 %v610_v44, %v483_v39 }
 0x315   :  { %v630_v46 = vmax.f32 %v616_v43, 0.0 }
 0x316   :  { %v629_v48 = vmax.f32 %v611_v45, 0.0  ;;  %v872_v49 = vpop.f32.mrb[6].mxu1 }
 0x317   :  { %v626_v50 = vadd.f32 %v872_v49, %v498_v47  ;;  %v620_v51 = vpop.f32.mrb[7].mxu1 }
 0x318   :  { %v901_v52 = vpack.c.bf16 %v630_v46, %v629_v48  ;;  %v621_v53 = vadd.f32 %v620_v51, %v493_v41 }
 0x319   :  { %v632_v54 = vmax.f32 %v626_v50, 0.0 }
 0x31a   :  { %v631_v55 = vmax.f32 %v621_v53, 0.0  ;;  %902 = vmatpush3.bf16.msra.mxu1 %v901_v52 }
 0x31b   :  { %903 = vmatprep.subr.bf16.mxu1 %v962_v37 }
 0x31c   :  { %v904_v56 = vpack.c.bf16 %v632_v54, %v631_v55 }
 0x31e   :  { %905 = vmatpush3.bf16.msra.mxu1 %v904_v56 }
 0x321   :  { %882 = vmatmul.mubr.msk.f32.vlgmr.msra.gmra.mrb[8].mxu1 %vm370_vm2, %v659_v57 }
 0x3f4   :  { %v744_v59 = vpop.f32.mrb[8].mxu1 }
 0x3f5   :  { %v745_v60 = vadd.f32 %v744_v59, %v641_v58  ;;  %v883_v61 = vpop.f32.mrb[9].mxu1 }
 0x3f7   :  { %935 = vtanh.f32 %v745_v60 }
 0x401   :  { %v936_v62 = vpop.eup %935 }
 0x402   :  { %750 = vst.msk [vmem:[#allocation2] sm:$0xf] %vm749_vm4, %v936_v62 }
 0x403   :  { %948 = shalt.err (!%p945_p4)
}
 0x404   :  { %s949_s18 = scalar_lea.hbm %s1188_s11, 64 }
 0x405   :  { %p950_p5 = scmp.ne.s32.totalorder %s1188_s11, %s949_s18  ;;  %p953_p6 = scmp.lt.u32.totalorder %s949_s18, %s1188_s11 }
 0x407   :  { %p955_p7 = pnand %p953_p6, %p950_p5 }
 0x409   :  { %958 = shalt.err (!%p955_p7)
}
 0x40a   :  { %760 = dma.vmem_to_hbm [thread:$0]  %s758_s15, 64, %s1188_s11, [#allocation3]  }
 0x40b   :  { %959 = dma.done.wait [#allocation3], 64  }
 0x40c   :  { %960 = vsyncadd [#allocation3], 4294967232 }
 0x40d   :  { %764 = vsyncpa [#allocation3], 1 }

</bundles_post_ra>
